<compile_context>
chip_gen: v5e
topology: v5e:2x2
jax: 0.10.0
libtpu: 0.0.40
codegen_flags: <defaults>
</compile_context>

<pallas_src>
import jax
import jax.numpy as jnp
from jax.experimental import pallas as pl
from jax.experimental.pallas import tpu as pltpu


# ---------------------------------------------------------------------------
# Helpers
# ---------------------------------------------------------------------------

def _round_up(x, m):
    return (x + m - 1) // m * m


def _chip_vmem_bytes():
    """Physical VMEM per core; conservative fallback if the query is unavailable."""
    try:
        info = pltpu.get_tpu_info()
        cap = getattr(info, "vmem_capacity_bytes", None)
        if cap:
            return int(cap)
    except Exception:
        pass
    return 64 * 1024 * 1024  # v7x-sized fallback (most restrictive)


def _vmem_limit(est_bytes):
    """1.5x headroom over the estimate, clamped to <=75% of physical VMEM."""
    cap = int(0.75 * _chip_vmem_bytes())
    return int(min(max(int(1.5 * est_bytes), 4 * 1024 * 1024), cap))


def _choose_h_tiling(hidden, d, weight_itemsize, tile_budget_bytes):
    """Pick (tile_h, H_pad): tile_h is a 128-multiple sized so the double-buffered
    w1/w2 tiles fit the budget; H is zero-padded to a multiple of tile_h.  If the
    full (128-padded) H fits, use a single grid step."""
    h_pad128 = _round_up(hidden, 128)
    max_th = tile_budget_bytes // max(1, 4 * d * weight_itemsize)
    tile_h = max(128, (max_th // 128) * 128)
    if tile_h >= h_pad128:
        return h_pad128, h_pad128          # n_k == 1: single full-H step
    return tile_h, _round_up(hidden, tile_h)


# ---------------------------------------------------------------------------
# Prefix MLP:  prefix = LeakyReLU(emb @ w1 + b1) @ w2 + b2       (dropout = id)
# ---------------------------------------------------------------------------

def _prefix_mlp_kernel(emb_ref, w1_ref, b1_ref, w2_ref, b2_ref, out_ref, acc_ref):
    k = pl.program_id(0)

    @pl.when(k == 0)
    def _():
        acc_ref[...] = jnp.zeros_like(acc_ref)

    # [P, D] @ [D, tH] -> [P, tH], f32 accumulation on the MXU.
    h = jnp.dot(emb_ref[...], w1_ref[...], preferred_element_type=jnp.float32)
    h = h + b1_ref[...]                       # [1, tH] broadcast, f32
    h = jnp.where(h > 0, h, 0.01 * h)         # LeakyReLU (PyTorch default slope 0.01)
    # TODO(synk): nn.Dropout(p=0.1) is identity at inference; training-mode
    # stochastic dropout (pltpu.prng_seed / prng_random_bits) is not emulated.

    # [P, tH] @ [tH, D] -> [P, D], accumulated over the H grid axis.
    # NOTE: with bf16 weights, h is downcast to bf16 before the second matmul
    # (slight extra error vs bf16-weights-only; covered by the loose tolerance).
    acc_ref[...] += jnp.dot(h.astype(w2_ref.dtype), w2_ref[...],
                            preferred_element_type=jnp.float32)

    @pl.when(k == pl.num_programs(0) - 1)
    def _():
        out_ref[...] = (acc_ref[...] + b2_ref[...]).astype(out_ref.dtype)


def compute_prefix(params, *, compute_dtype=jnp.bfloat16, out_dtype=None,
                   tile_budget_bytes=16 * 1024 * 1024):
    """Run the prefix MLP in a Pallas kernel.

    Depends only on `params` (not on x): call once per weight update and reuse
    the result across forward steps.  Pass out_dtype=x.dtype so the hot-path
    concat needs no casts.  compute_dtype=None keeps the weights' own dtype.
    """
    emb, w1, b1, w2, b2 = (params["emb"], params["w1"], params["b1"],
                           params["w2"], params["b2"])
    out_dtype = out_dtype or params["emb"].dtype
    if compute_dtype is not None:
        emb = emb.astype(compute_dtype)
        w1 = w1.astype(compute_dtype)
        w2 = w2.astype(compute_dtype)

    P, D = emb.shape
    H = w1.shape[1]
    wbytes = jnp.dtype(emb.dtype).itemsize

    # Pad prefix rows to the dtype's sublane multiple (8 f32, 16 bf16, 32 int8).
    sub = max(8, 32 // wbytes)
    P_pad = _round_up(P, sub)
    if P_pad != P:
        emb = jnp.pad(emb, ((0, P_pad - P), (0, 0)))

    # Tile H against the VMEM budget; zero-pad H so every block is full-sized
    # (exact math: padded w1 cols / b1 entries / w2 rows are zero).
    tile_h, H_pad = _choose_h_tiling(H, D, wbytes, tile_budget_bytes)
    if H_pad != H:
        w1 = jnp.pad(w1, ((0, 0), (0, H_pad - H)))
        b1 = jnp.pad(b1, ((0, H_pad - H),))
        w2 = jnp.pad(w2, ((0, H_pad - H), (0, 0)))
    n_k = H_pad // tile_h

    b1_2d = b1.reshape(1, H_pad).astype(jnp.float32)
    b2_2d = b2.reshape(1, D).astype(jnp.float32)

    est = (4 * D * tile_h * wbytes      # w1 + w2 tiles, double-buffered
           + 2 * P_pad * D * wbytes     # emb (resident, double-buffered)
           + 2 * (tile_h + D) * 4       # biases
           + 2 * P_pad * D * 4          # f32 accumulator
           + 2 * P_pad * D * jnp.dtype(out_dtype).itemsize)  # output block

    prefix = pl.pallas_call(
        _prefix_mlp_kernel,
        out_shape=jax.ShapeDtypeStruct((P_pad, D), out_dtype),
        grid_spec=pltpu.PrefetchScalarGridSpec(
            num_scalar_prefetch=0,
            grid=(n_k,),
            in_specs=[
                pl.BlockSpec((P_pad, D), lambda k: (0, 0)),     # emb (resident)
                pl.BlockSpec((D, tile_h), lambda k: (0, k)),    # w1 H-tile
                pl.BlockSpec((1, tile_h), lambda k: (0, k)),    # b1 H-tile
                pl.BlockSpec((tile_h, D), lambda k: (k, 0)),    # w2 H-tile
                pl.BlockSpec((1, D), lambda k: (0, 0)),         # b2 (resident)
            ],
            out_specs=pl.BlockSpec((P_pad, D), lambda k: (0, 0)),
            scratch_shapes=[pltpu.VMEM((P_pad, D), jnp.float32)],
        ),
        compiler_params=pltpu.CompilerParams(
            dimension_semantics=("arbitrary",),     # H axis is a reduction
            vmem_limit_bytes=_vmem_limit(est),
        ),
    )(emb, w1, b1_2d, w2, b2_2d)

    return prefix[:P] if P_pad != P else prefix


# ---------------------------------------------------------------------------
# Concat:  out[b] = [prefix; x[b]]   -- the only per-step work, pure HBM->HBM DMA.
# ---------------------------------------------------------------------------

def _concat_dma_kernel(prefix_hbm, x_hbm, out_hbm, sems):
    b = pl.program_id(0)
    nb = pl.num_programs(0)
    P = prefix_hbm.shape[0]
    S = x_hbm.shape[1]
    slot = b & 1

    def copies(row, s):
        cp = pltpu.make_async_copy(prefix_hbm,
                                   out_hbm.at[row, pl.ds(0, P), :],
                                   sems.at[s, 0])
        cx = pltpu.make_async_copy(x_hbm.at[row],
                                   out_hbm.at[row, pl.ds(P, S), :],
                                   sems.at[s, 1])
        return cp, cx

    # Start this row's copies first, then drain the previous row's copies so
    # consecutive rows overlap on the DMA engines (sequential grid axis).
    cp, cx = copies(b, slot)
    cp.start()
    cx.start()

    @pl.when(b > 0)
    def _():
        pp, px = copies(b - 1, 1 - slot)
        pp.wait()
        px.wait()

    @pl.when(b == nb - 1)
    def _():
        lp, lx = copies(b, slot)
        lp.wait()
        lx.wait()


def prefix_concat(prefix, x):
    """prefix [P, D], x [B, S, D] -> [B, P+S, D] via direct HBM->HBM DMA.

    No VMEM staging: works for arbitrary S/D on all TPU generations (incl. v7x's
    64 MiB VMEM) since the kernel's VMEM footprint is ~0.
    """
    P, D = prefix.shape
    B, S, _ = x.shape
    if prefix.dtype != x.dtype:
        # Off the recommended path: precompute the prefix with out_dtype=x.dtype
        # so this wrapper-side cast never runs in the per-step hot loop.
        prefix = prefix.astype(x.dtype)

    return pl.pallas_call(
        _concat_dma_kernel,
        out_shape=jax.ShapeDtypeStruct((B, P + S, D), x.dtype),
        grid_spec=pltpu.PrefetchScalarGridSpec(
            num_scalar_prefetch=0,
            grid=(B,),
            in_specs=[
                pl.BlockSpec(memory_space=pl.ANY),   # prefix stays in HBM
                pl.BlockSpec(memory_space=pl.ANY),   # x stays in HBM
            ],
            out_specs=pl.BlockSpec(memory_space=pl.ANY),  # output written by DMA
            scratch_shapes=[pltpu.SemaphoreType.DMA((2, 2))],
        ),
        compiler_params=pltpu.CompilerParams(
            # Sequential issue is required by the 1-deep wait-previous pipeline;
            # the bytes are moved by the DMA engines, not the TensorCore, so
            # core-parallelism is irrelevant here.
            dimension_semantics=("arbitrary",),
        ),
    )(prefix, x)


def prefix_tuning_forward(x, params, prefix=None, **prefix_kwargs):
    """x: [B, S, D] -> [B, P+S, D].

    Pass a precomputed `prefix` (from compute_prefix(..., out_dtype=x.dtype)) so
    the x-independent MLP stays out of the per-step hot path.
    """
    if prefix is None:
        prefix_kwargs.setdefault("out_dtype", x.dtype)
        prefix = compute_prefix(params, **prefix_kwargs)
    return prefix_concat(prefix, x)


def init_params(key, prefix_num, input_size, encoder_hidden_size, dtype=jnp.float32):
    k_emb, k_w1, k_b1, k_w2, k_b2 = jax.random.split(key, 5)
    return {
        "emb": jax.random.normal(k_emb, (prefix_num, input_size), dtype) * 0.02,
        "w1": jax.random.normal(k_w1, (input_size, encoder_hidden_size), dtype) * 0.02,
        "b1": jax.random.normal(k_b1, (encoder_hidden_size,), dtype) * 0.02,
        "w2": jax.random.normal(k_w2, (encoder_hidden_size, input_size), dtype) * 0.02,
        "b2": jax.random.normal(k_b2, (input_size,), dtype) * 0.02,
    }


if __name__ == "__main__":
    # Small shapes consistent with the module's forward.
    B, S = 2, 8              # batch, input sequence length
    P = 8                    # prefix_num
    D = 32                   # input_size
    H = 64                   # encoder_hidden_size

    key = jax.random.PRNGKey(0)
    k_params, k_x = jax.random.split(key)
    params = init_params(k_params, P, D, H)
    x = jax.random.normal(k_x, (B, S, D), jnp.float32)

    # Plain-JAX reference.
    h_ref = params["emb"] @ params["w1"] + params["b1"]
    h_ref = jnp.where(h_ref > 0, h_ref, 0.01 * h_ref)
    prefix_ref = h_ref @ params["w2"] + params["b2"]
    ref = jnp.concatenate(
        [jnp.broadcast_to(prefix_ref[None], (B, P, D)), x], axis=1)

    # f32 compute path (tight tolerance); prefix hoisted out of the hot path.
    prefix_f32 = jax.block_until_ready(
        compute_prefix(params, compute_dtype=jnp.float32, out_dtype=x.dtype))
    out = jax.block_until_ready(prefix_tuning_forward(x, params, prefix=prefix_f32))
    assert out.shape == (B, P + S, D), out.shape
    assert jnp.allclose(out, ref, atol=1e-5, rtol=1e-5)

    # Default bf16-weight path (MXU/DMA friendly); loose tolerance on prefix rows,
    # exact pass-through of x rows (pure DMA copy).
    prefix_bf16 = jax.block_until_ready(compute_prefix(params, out_dtype=x.dtype))
    out_bf16 = jax.block_until_ready(
        prefix_tuning_forward(x, params, prefix=prefix_bf16))
    assert jnp.allclose(out_bf16[:, :P, :], prefix_ref[None], atol=1e-2, rtol=1e-1)
    assert jnp.array_equal(out_bf16[:, P:, :], x)

    print("KERNEL_OK")
</pallas_src>

<mosaic_0001>
module attributes {stable_mosaic.version = 11 : i64} {
  func.func @_prefix_mlp_kernel(%arg0: i32, %arg1: memref<8x32xf32, #tpu.memory_space<vmem>>, %arg2: memref<32x128xf32, #tpu.memory_space<vmem>>, %arg3: memref<1x128xf32, #tpu.memory_space<vmem>>, %arg4: memref<128x32xf32, #tpu.memory_space<vmem>>, %arg5: memref<1x32xf32, #tpu.memory_space<vmem>>, %arg6: memref<8x32xf32, #tpu.memory_space<vmem>>, %arg7: memref<8x32xf32, #tpu.memory_space<vmem>>) attributes {dimension_semantics = [#tpu.dimension_semantics<arbitrary>], iteration_bounds = array<i64: 1>, scalar_prefetch = 0 : i64, scratch_operands = 1 : i64, tpu.core_type = #tpu.core_type<tc>, window_params = [{pipeline_mode = #tpu.pipeline_mode<synchronous>, transform_indices = @transform_0, window_bounds = array<i64: 8, 32>}, {transform_indices = @transform_1, window_bounds = array<i64: 32, 128>}, {transform_indices = @transform_2, window_bounds = array<i64: 1, 128>}, {transform_indices = @transform_3, window_bounds = array<i64: 128, 32>}, {pipeline_mode = #tpu.pipeline_mode<synchronous>, transform_indices = @transform_4, window_bounds = array<i64: 1, 32>}, {pipeline_mode = #tpu.pipeline_mode<synchronous>, transform_indices = @transform_5, window_bounds = array<i64: 8, 32>}]} {
    %c0_i32 = arith.constant 0 : i32
    %0 = arith.cmpi eq, %arg0, %c0_i32 : i32
    %1 = arith.extui %0 : i1 to i32
    %c0_i32_0 = arith.constant 0 : i32
    %2 = arith.cmpi ne, %1, %c0_i32_0 : i32
    scf.if %2 {
      %cst_17 = arith.constant 0.000000e+00 : f32
      %22 = vector.broadcast %cst_17 : f32 to vector<8x32xf32>
      %c0_18 = arith.constant 0 : index
      %c0_19 = arith.constant 0 : index
      %23 = vector.load %arg7[%c0_18, %c0_19] : memref<8x32xf32, #tpu.memory_space<vmem>>, vector<8x32xf32>
      tpu.vector_store %arg7[%c0_18, %c0_19], %22 {strides = array<i32>} : memref<8x32xf32, #tpu.memory_space<vmem>>, vector<8x32xf32>,
    } else {
    }
    %c0 = arith.constant 0 : index
    %c0_1 = arith.constant 0 : index
    %3 = vector.load %arg1[%c0, %c0_1] : memref<8x32xf32, #tpu.memory_space<vmem>>, vector<8x32xf32>
    %c0_2 = arith.constant 0 : index
    %c0_3 = arith.constant 0 : index
    %4 = vector.load %arg2[%c0_2, %c0_3] : memref<32x128xf32, #tpu.memory_space<vmem>>, vector<32x128xf32>
    %cst = arith.constant dense<0.000000e+00> : vector<8x128xf32>
    %5 = tpu.matmul %3, %4, %cst {dimension_numbers = #tpu.dot_dimension_numbers<[1], [0], [0], [1], [0, 0, 1, 1], [], []>} : vector<8x32xf32>, vector<32x128xf32>, vector<8x128xf32> -> vector<8x128xf32>
    %c0_4 = arith.constant 0 : index
    %c0_5 = arith.constant 0 : index
    %6 = vector.load %arg3[%c0_4, %c0_5] : memref<1x128xf32, #tpu.memory_space<vmem>>, vector<1x128xf32>
    %7 = vector.broadcast %6 : vector<1x128xf32> to vector<8x128xf32>
    %8 = arith.addf %5, %7 : vector<8x128xf32>
    %cst_6 = arith.constant 0.000000e+00 : f32
    %9 = vector.broadcast %cst_6 : f32 to vector<8x128xf32>
    %10 = arith.cmpf ogt, %8, %9 : vector<8x128xf32>
    %cst_7 = arith.constant 0.00999999977 : f32
    %11 = vector.broadcast %cst_7 : f32 to vector<8x128xf32>
    %12 = arith.mulf %11, %8 : vector<8x128xf32>
    %13 = arith.select %10, %8, %12 : vector<8x128xi1>, vector<8x128xf32>
    %c0_8 = arith.constant 0 : index
    %c0_9 = arith.constant 0 : index
    %14 = vector.load %arg7[%c0_8, %c0_9] : memref<8x32xf32, #tpu.memory_space<vmem>>, vector<8x32xf32>
    %c0_10 = arith.constant 0 : index
    %c0_11 = arith.constant 0 : index
    %15 = vector.load %arg4[%c0_10, %c0_11] : memref<128x32xf32, #tpu.memory_space<vmem>>, vector<128x32xf32>
    %cst_12 = arith.constant dense<0.000000e+00> : vector<8x32xf32>
    %16 = tpu.matmul %13, %15, %cst_12 {dimension_numbers = #tpu.dot_dimension_numbers<[1], [0], [0], [1], [0, 0, 1, 1], [], []>} : vector<8x128xf32>, vector<128x32xf32>, vector<8x32xf32> -> vector<8x32xf32>
    %17 = arith.addf %14, %16 : vector<8x32xf32>
    %c0_13 = arith.constant 0 : index
    %c0_14 = arith.constant 0 : index
    %18 = vector.load %arg7[%c0_13, %c0_14] : memref<8x32xf32, #tpu.memory_space<vmem>>, vector<8x32xf32>
    tpu.vector_store %arg7[%c0_13, %c0_14], %17 {strides = array<i32>} : memref<8x32xf32, #tpu.memory_space<vmem>>, vector<8x32xf32>,
    %c0_i32_15 = arith.constant 0 : i32
    %19 = arith.cmpi eq, %arg0, %c0_i32_15 : i32
    %20 = arith.extui %19 : i1 to i32
    %c0_i32_16 = arith.constant 0 : i32
    %21 = arith.cmpi ne, %20, %c0_i32_16 : i32
    scf.if %21 {
      %c0_17 = arith.constant 0 : index
      %c0_18 = arith.constant 0 : index
      %22 = vector.load %arg7[%c0_17, %c0_18] : memref<8x32xf32, #tpu.memory_space<vmem>>, vector<8x32xf32>
      %c0_19 = arith.constant 0 : index
      %c0_20 = arith.constant 0 : index
      %23 = vector.load %arg5[%c0_19, %c0_20] : memref<1x32xf32, #tpu.memory_space<vmem>>, vector<1x32xf32>
      %24 = vector.broadcast %23 : vector<1x32xf32> to vector<8x32xf32>
      %25 = arith.addf %22, %24 : vector<8x32xf32>
      %c0_21 = arith.constant 0 : index
      %c0_22 = arith.constant 0 : index
      %26 = vector.load %arg6[%c0_21, %c0_22] : memref<8x32xf32, #tpu.memory_space<vmem>>, vector<8x32xf32>
      tpu.vector_store %arg6[%c0_21, %c0_22], %25 {strides = array<i32>} : memref<8x32xf32, #tpu.memory_space<vmem>>, vector<8x32xf32>,
    } else {
    }
    return
  }
  func.func @transform_0(%arg0: i32) -> (i32, i32) {
    %c0_i32 = arith.constant 0 : i32
    %c0_i32_0 = arith.constant 0 : i32
    %c0_i32_1 = arith.constant 0 : i32
    return %c0_i32, %c0_i32_0 : i32, i32
  }
  func.func @transform_1(%arg0: i32) -> (i32, i32) {
    %c0_i32 = arith.constant 0 : i32
    %c0_i32_0 = arith.constant 0 : i32
    return %c0_i32, %arg0 : i32, i32
  }
  func.func @transform_2(%arg0: i32) -> (i32, i32) {
    %c0_i32 = arith.constant 0 : i32
    %c0_i32_0 = arith.constant 0 : i32
    return %c0_i32, %arg0 : i32, i32
  }
  func.func @transform_3(%arg0: i32) -> (i32, i32) {
    %c0_i32 = arith.constant 0 : i32
    %c0_i32_0 = arith.constant 0 : i32
    return %arg0, %c0_i32 : i32, i32
  }
  func.func @transform_4(%arg0: i32) -> (i32, i32) {
    %c0_i32 = arith.constant 0 : i32
    %c0_i32_0 = arith.constant 0 : i32
    %c0_i32_1 = arith.constant 0 : i32
    return %c0_i32, %c0_i32_0 : i32, i32
  }
  func.func @transform_5(%arg0: i32) -> (i32, i32) {
    %c0_i32 = arith.constant 0 : i32
    %c0_i32_0 = arith.constant 0 : i32
    %c0_i32_1 = arith.constant 0 : i32
    return %c0_i32, %c0_i32_0 : i32, i32
  }
}

</mosaic_0001>

<bundles_post_ra>
// kernel: tpu_custom_call.1
= control target key start
LH: loop header
LB: loop body
LE: loop exit
PB: predicated region body
PF: predicated region fallthrough
CT: control target
= control target key end

     0   :  { %vm25_vm0 = vcmask 261120   ;;  %v159_v2 = vmov 0.0   ;;  %s267_s0 = inlined_call_operand.vmem [shape: f32[8,32], index: 0, kind: input, shape index: {}]   ;;  %s268_s1 = inlined_call_operand.vmem [shape: f32[32,128], index: 1, kind: input, shape index: {}]   ;;  %s269_s2 = inlined_call_operand.vmem [shape: f32[1,128], index: 2, kind: input, shape index: {}]   ;;  %s270_s3 = inlined_call_operand.vmem [shape: f32[128,32], index: 3, kind: input, shape index: {}]   ;;  %s271_s4 = inlined_call_operand.vmem [shape: f32[1,32], index: 4, kind: input, shape index: {}]   ;;  %s272_s5 = inlined_call_operand.hbm [shape: f32[8,32], index: 5, kind: output, shape index: {}]  }
   0x1   :  { %v31_v0 = vld [vmem:[%s268_s1 + $0x18] sm:$0xff]  ;;  %v30_v1 = vld [vmem:[%s268_s1 + $0x10] sm:$0xff]  ;;  %26 = vst.msk [vmem:[#allocation2] sm:$0xff] %vm25_vm0, %v159_v2  ;;  %v29_v4 = vld [vmem:[%s268_s1 + $0x8] sm:$0xff] }
   0x2   :  { %52 = vmatpush.msra.mxu0 %v31_v0  ;;  %v79_v3 = vld [vmem:[%s270_s3 + $0x78] sm:$0xff]  ;;  %v78_v5 = vld [vmem:[%s270_s3 + $0x70] sm:$0xff]  ;;  %v77_v6 = vld [vmem:[%s270_s3 + $0x68] sm:$0xff] }
   0x3   :  { %80 = vmatpush.msra.mxu1 %v79_v3  ;;  %v28_v7 = vld [vmem:[%s268_s1] sm:$0xff] }
   0x4   :  { %53 = vmatpush.msra.mxu0 %v30_v1  ;;  %v27_v8 = vld [vmem:[%s267_s0] sm:$0xff] }
   0x5   :  { %81 = vmatpush.msra.mxu1 %v78_v5  ;;  %v76_v9 = vld [vmem:[%s270_s3 + $0x60] sm:$0xff] }
   0x6   :  { %54 = vmatpush.msra.mxu0 %v29_v4 }
   0x7   :  { %82 = vmatpush.msra.mxu1 %v77_v6 }
   0x8   :  { %10 = vsyncpa [#allocation4], 0  ;;  %55 = vmatpush.msra.mxu0 %v28_v7  ;;  %v75_v10 = vld [vmem:[%s270_s3 + $0x58] sm:$0xff]  ;;  %v74_v11 = vld [vmem:[%s270_s3 + $0x50] sm:$0xff] }
   0x9   :  { %128 = vmatmul.msk.f32.vlgmr.msra.gmra.mxu0 %vm25_vm0, %v27_v8  ;;  %83 = vmatpush.msra.mxu1 %v76_v9  ;;  %v73_v12 = vld [vmem:[%s270_s3 + $0x48] sm:$0xff]  ;;  %v72_v13 = vld [vmem:[%s270_s3 + $0x40] sm:$0xff]  ;;  %v71_v14 = vld [vmem:[%s270_s3 + $0x38] sm:$0xff] }
   0xa   :  { %v70_v15 = vld [vmem:[%s270_s3 + $0x30] sm:$0xff]  ;;  %v69_v16 = vld [vmem:[%s270_s3 + $0x28] sm:$0xff]  ;;  %v68_v17 = vld [vmem:[%s270_s3 + $0x20] sm:$0xff] }
   0xb   :  { %84 = vmatpush.msra.mxu1 %v75_v10  ;;  %v67_v18 = vld [vmem:[%s270_s3 + $0x18] sm:$0xff]  ;;  %v66_v19 = vld [vmem:[%s270_s3 + $0x10] sm:$0xff]  ;;  %v65_v20 = vld [vmem:[%s270_s3 + $0x8] sm:$0xff] }
   0xc   :  { %v64_v21 = vld [vmem:[%s270_s3] sm:$0xff]  ;;  %s160_s3 = smov [#allocation3]  }
   0xd   :  { %85 = vmatpush.msra.mxu1 %v74_v11  ;;  %v131_v22 = vld [vmem:[%s269_s2] ss:$0 sm:$0xff]  ;;  %s117_s12 = sshll.u32 %s160_s3, 4  ;;  %s119_s2 = sshll.u32 %s272_s5, 4  ;;  %s118_s12 = int_to_ptr.vmem [resolvable:$true] %s117_s12  ;;  %s120_s2 = int_to_ptr.hbm [resolvable:$true] %s119_s2 }
   0xe   :  { %v63_v27 = vld [vmem:[#allocation2] sm:$0xff] }
   0xf   :  { %86 = vmatpush.msra.mxu1 %v73_v12  ;;  %v132_v30 = vld [vmem:[%s271_s4] ss:$0 sm:$0xff] }
  0x11   :  { %87 = vmatpush.msra.mxu1 %v72_v13 }
  0x13   :  { %88 = vmatpush.msra.mxu1 %v71_v14 }
  0x15   :  { %89 = vmatpush.msra.mxu1 %v70_v15 }
  0x17   :  { %90 = vmatpush.msra.mxu1 %v69_v16 }
  0x19   :  { %91 = vmatpush.msra.mxu1 %v68_v17 }
  0x1b   :  { %92 = vmatpush.msra.mxu1 %v67_v18 }
  0x1d   :  { %93 = vmatpush.msra.mxu1 %v66_v19 }
  0x1f   :  { %94 = vmatpush.msra.mxu1 %v65_v20 }
  0x21   :  { %95 = vmatpush.msra.mxu1 %v64_v21 }
  0x86   :  { %v57_v23 = vpop.f32.mrf.mxu0 }
  0x87   :  { %v58_v24 = vadd.f32 %v131_v22, %v57_v23 }
  0x89   :  { %vm60_vm1 = vcmp.gt.f32.partialorder %v58_v24, 0.0  ;;  %v61_v25 = vmul.f32 0.01, %v58_v24 }
  0x8b   :  { %v62_v26 = vsel %vm60_vm1, %v58_v24, %v61_v25 }
  0x8c   :  { %96 = vmatmul.f32.vlgmr.msra.gmra.mxu1 %v62_v26 }
 0x109   :  { %v97_v28 = vpop.f32.mrf.mxu1 }
 0x10a   :  { %v100_v29 = vadd.f32 %v97_v28, %v63_v27 }
 0x10c   :  { %101 = vst.msk [vmem:[#allocation2] sm:$0xff] %vm25_vm0, %v100_v29 }
 0x113   :  { %v105_v31 = vld [vmem:[#allocation2] sm:$0xff] }
 0x114   :  { %v110_v32 = vadd.f32 %v132_v30, %v105_v31 }
 0x116   :  { %111 = vst.msk [vmem:[#allocation3] sm:$0xff] %vm25_vm0, %v110_v32 }
 0x117   :  { %122 = dma.vmem_to_hbm [thread:$0]  %s118_s12, 128, %s120_s2, [#allocation4]  }
 0x118   :  { %157 = dma.done.wait [#allocation4], 128  }
 0x119   :  { %158 = vsyncadd [#allocation4], 4294967168 }
 0x11a   :  { %127 = vsyncpa [#allocation4], 1 }

</bundles_post_ra>
